<compile_context>
chip_gen: v7x
topology: tpu7x:2x2x1
jax: 0.10.0
libtpu: 0.0.40
codegen_flags: <defaults>
</compile_context>

<pallas_src>
import math

import jax
import jax.numpy as jnp
from jax.experimental import pallas as pl
from jax.experimental.pallas import tpu as pltpu


def make_positional_encoding(d_model: int, max_len: int = 5000) -> jnp.ndarray:
    """Deterministic sinusoidal PE buffer, shape (1, max_len, d_model), float32."""
    position = jnp.arange(0, max_len, dtype=jnp.float32)[:, None]
    div_term = jnp.exp(
        jnp.arange(0, d_model, 2, dtype=jnp.float32) * (-math.log(10000.0) / d_model)
    )
    angles = position * div_term                                  # (max_len, ceil(D/2))
    pe = jnp.zeros((max_len, d_model), dtype=jnp.float32)
    pe = pe.at[:, 0::2].set(jnp.sin(angles))
    pe = pe.at[:, 1::2].set(jnp.cos(angles)[:, : d_model // 2])
    return pe[None, :, :]                                         # (1, max_len, d_model)


def _pe_add_kernel(x_ref, pe_ref, o_ref):
    # f32 add (pe kept f32 in VMEM), cast only the result to the activation
    # dtype.  Pure VPU work, hidden under the DMA.
    o_ref[...] = (
        x_ref[...].astype(jnp.float32) + pe_ref[...].astype(jnp.float32)
    ).astype(o_ref.dtype)


def _block_budget_and_vmem_cap():
    """(per-block byte budget, physical VMEM capacity) for the current TPU."""
    vmem_cap = 64 * 1024 * 1024                       # conservative fallback (v7x TC)
    try:
        vmem_cap = int(pltpu.get_tpu_info().vmem_capacity_bytes)
    except Exception:
        pass
    if vmem_cap <= 64 * 1024 * 1024:                  # v7x-class: 64 MiB per TC
        budget = 4 * 1024 * 1024
    else:                                             # v5e / v6e: 128 MiB
        budget = 6 * 1024 * 1024
    return budget, vmem_cap


def _vmem_limit_bytes(block_bytes_list, vmem_cap):
    """Scoped-VMEM request sized to actual need, capped below physical VMEM."""
    need = 2 * sum(block_bytes_list) + (4 << 20)      # double-buffered streams + slack
    ceiling = vmem_cap - (8 << 20)                    # headroom for compiler scratch
    return int(min(max(need, 32 << 20), ceiling))


def _choose_tile_s(S: int, D: int, itemsize: int, budget: int) -> int:
    """Largest multiple-of-8 row tile within budget (<= S); full S if S < 8."""
    if S <= 8:
        return S
    rows = (budget // max(1, D * itemsize)) // 8 * 8
    s_cap = (S // 8) * 8
    return max(8, min(rows, s_cap))


def _choose_tile_f(F: int, tile_b: int, itemsize: int, budget: int) -> int:
    """Largest multiple-of-128 lane tile within budget (<= F); full F if F < 128."""
    if F < 128:
        return F
    lanes = (budget // max(1, tile_b * itemsize)) // 128 * 128
    f_cap = (F // 128) * 128
    return max(128, min(lanes, f_cap))


def positional_encoding_forward(
    x: jnp.ndarray, pe: jnp.ndarray, *, donate_x: bool = False
) -> jnp.ndarray:
    """y = x + pe[:, :S]  for x of shape (B, S, D)."""
    B, S, D = x.shape
    assert pe.ndim == 3 and pe.shape[0] == 1 and pe.shape[2] == D
    max_len = pe.shape[1]
    assert S <= max_len, f"sequence length {S} exceeds max_len {max_len}"

    itemsize = jnp.dtype(x.dtype).itemsize
    pe_itemsize = jnp.dtype(pe.dtype).itemsize
    budget, vmem_cap = _block_budget_and_vmem_cap()
    aliases = {0: 0} if donate_x else {}

    if D % 128 == 0:
        # Lane-aligned d_model: tile the sequence dim (cdiv grid, ragged edge
        # masked by Pallas), batch innermost so the pe block is resident
        # across the batch loop.
        tile_s = _choose_tile_s(S, D, itemsize, budget)
        num_s = pl.cdiv(S, tile_s)
        blk_elems = tile_s * D
        vmem_limit = _vmem_limit_bytes(
            [blk_elems * itemsize, blk_elems * pe_itemsize, blk_elems * itemsize],
            vmem_cap,
        )
        return pl.pallas_call(
            _pe_add_kernel,
            out_shape=jax.ShapeDtypeStruct((B, S, D), x.dtype),
            grid_spec=pltpu.PrefetchScalarGridSpec(
                num_scalar_prefetch=0,
                grid=(num_s, B),                                   # b innermost -> pe reuse
                in_specs=[
                    pl.BlockSpec((1, tile_s, D), lambda s, b: (b, s, 0)),   # x
                    pl.BlockSpec((1, tile_s, D), lambda s, b: (0, s, 0)),   # pe
                ],
                out_specs=pl.BlockSpec((1, tile_s, D), lambda s, b: (b, s, 0)),
            ),
            compiler_params=pltpu.CompilerParams(
                dimension_semantics=("parallel", "parallel"),
                vmem_limit_bytes=vmem_limit,
            ),
            input_output_aliases=aliases,
        )(x, pe)

    # d_model not a multiple of 128: present a lane-dense flattened layout and
    # tile both batch (8-row sublane-dense blocks) and the flattened dim
    # (multiples of 128); ragged edges in either dim are masked by Pallas.
    F = S * D
    x2 = x.reshape(B, F)
    pe_flat = pe.reshape(1, max_len * D)               # free contiguous reshape;
                                                       # prefix == pe[:, :S] flattened
    tile_b = B if B < 8 else 8
    tile_f = _choose_tile_f(F, tile_b, itemsize, budget)
    num_f = pl.cdiv(F, tile_f)
    num_b = pl.cdiv(B, tile_b)
    vmem_limit = _vmem_limit_bytes(
        [tile_b * tile_f * itemsize, tile_f * pe_itemsize, tile_b * tile_f * itemsize],
        vmem_cap,
    )
    out = pl.pallas_call(
        _pe_add_kernel,
        out_shape=jax.ShapeDtypeStruct((B, F), x.dtype),
        grid_spec=pltpu.PrefetchScalarGridSpec(
            num_scalar_prefetch=0,
            grid=(num_f, num_b),                                   # b innermost -> pe reuse
            in_specs=[
                pl.BlockSpec((tile_b, tile_f), lambda f, b: (b, f)),   # x
                pl.BlockSpec((1, tile_f), lambda f, b: (0, f)),        # pe (bcast in-kernel)
            ],
            out_specs=pl.BlockSpec((tile_b, tile_f), lambda f, b: (b, f)),
        ),
        compiler_params=pltpu.CompilerParams(
            dimension_semantics=("parallel", "parallel"),
            vmem_limit_bytes=vmem_limit,
        ),
        input_output_aliases=aliases,
    )(x2, pe_flat)
    return out.reshape(B, S, D)


if __name__ == "__main__":
    key = jax.random.PRNGKey(0)
    k1, k2, k3, k4 = jax.random.split(key, 4)
    max_len = 64

    # --- Case 1: module-consistent small shapes (d_model < 128 -> flattened path).
    B, S, D = 2, 8, 32
    x = jax.random.normal(k1, (B, S, D), dtype=jnp.float32)
    pe = make_positional_encoding(D, max_len=max_len)
    y = jax.block_until_ready(positional_encoding_forward(x, pe))
    y_ref = x + pe[:, :S].astype(x.dtype)
    assert y.shape == (B, S, D)
    assert jnp.allclose(y, y_ref, atol=1e-6, rtol=1e-6)

    # --- Case 2: lane-aligned d_model (S-tiled 3D path).
    B2, S2, D2 = 2, 16, 128
    x2 = jax.random.normal(k2, (B2, S2, D2), dtype=jnp.float32)
    pe2 = make_positional_encoding(D2, max_len=max_len)
    y2 = jax.block_until_ready(positional_encoding_forward(x2, pe2))
    y2_ref = x2 + pe2[:, :S2].astype(x2.dtype)
    assert y2.shape == (B2, S2, D2)
    assert jnp.allclose(y2, y2_ref, atol=1e-6, rtol=1e-6)

    # --- Case 3: ragged sequence length (exercises cdiv masking, aligned path).
    B3, S3, D3 = 3, 20, 128
    x3 = jax.random.normal(k3, (B3, S3, D3), dtype=jnp.float32)
    pe3 = make_positional_encoding(D3, max_len=max_len)
    y3 = jax.block_until_ready(positional_encoding_forward(x3, pe3))
    y3_ref = x3 + pe3[:, :S3].astype(x3.dtype)
    assert y3.shape == (B3, S3, D3)
    assert jnp.allclose(y3, y3_ref, atol=1e-6, rtol=1e-6)

    # --- Case 4: flattened dim not a multiple of 128 (cdiv masking, flattened path).
    B4, S4, D4 = 2, 5, 48
    x4 = jax.random.normal(k4, (B4, S4, D4), dtype=jnp.float32)
    pe4 = make_positional_encoding(D4, max_len=max_len)
    y4 = jax.block_until_ready(positional_encoding_forward(x4, pe4))
    y4_ref = x4 + pe4[:, :S4].astype(x4.dtype)
    assert y4.shape == (B4, S4, D4)
    assert jnp.allclose(y4, y4_ref, atol=1e-6, rtol=1e-6)

    print("KERNEL_OK")
</pallas_src>

<mosaic_0001>
module attributes {stable_mosaic.version = 11 : i64} {
  func.func @_pe_add_kernel(%arg0: i32, %arg1: i32, %arg2: memref<2x256xf32, #tpu.memory_space<vmem>>, %arg3: memref<1x256xf32, #tpu.memory_space<vmem>>, %arg4: memref<2x256xf32, #tpu.memory_space<vmem>>) attributes {dimension_semantics = [#tpu.dimension_semantics<parallel>, #tpu.dimension_semantics<parallel>], iteration_bounds = array<i64: 1, 1>, scalar_prefetch = 0 : i64, scratch_operands = 0 : i64, tpu.core_type = #tpu.core_type<tc>, window_params = [{transform_indices = @transform_0, window_bounds = array<i64: 2, 256>}, {transform_indices = @transform_1, window_bounds = array<i64: 1, 256>}, {transform_indices = @transform_2, window_bounds = array<i64: 2, 256>}]} {
    %c0 = arith.constant 0 : index
    %c0_0 = arith.constant 0 : index
    %0 = vector.load %arg2[%c0, %c0_0] : memref<2x256xf32, #tpu.memory_space<vmem>>, vector<2x256xf32>
    %c0_1 = arith.constant 0 : index
    %c0_2 = arith.constant 0 : index
    %1 = vector.load %arg3[%c0_1, %c0_2] : memref<1x256xf32, #tpu.memory_space<vmem>>, vector<1x256xf32>
    %2 = vector.broadcast %1 : vector<1x256xf32> to vector<2x256xf32>
    %3 = arith.addf %0, %2 : vector<2x256xf32>
    %c0_3 = arith.constant 0 : index
    %c0_4 = arith.constant 0 : index
    %4 = vector.load %arg4[%c0_3, %c0_4] : memref<2x256xf32, #tpu.memory_space<vmem>>, vector<2x256xf32>
    tpu.vector_store %arg4[%c0_3, %c0_4], %3 {strides = array<i32>} : memref<2x256xf32, #tpu.memory_space<vmem>>, vector<2x256xf32>,
    return
  }
  func.func @transform_0(%arg0: i32, %arg1: i32) -> (i32, i32) {
    %c0_i32 = arith.constant 0 : i32
    return %arg1, %arg0 : i32, i32
  }
  func.func @transform_1(%arg0: i32, %arg1: i32) -> (i32, i32) {
    %c0_i32 = arith.constant 0 : i32
    %c0_i32_0 = arith.constant 0 : i32
    return %c0_i32, %arg0 : i32, i32
  }
  func.func @transform_2(%arg0: i32, %arg1: i32) -> (i32, i32) {
    %c0_i32 = arith.constant 0 : i32
    return %arg1, %arg0 : i32, i32
  }
}

</mosaic_0001>

<bundles_post_ra>
// kernel: tpu_custom_call.1
= control target key start
LH: loop header
LB: loop body
LE: loop exit
PB: predicated region body
PF: predicated region fallthrough
CT: control target
= control target key end

     0   :  { %7 = vsyncpa [#allocation3], 0  ;;  %s215_s0 = inlined_call_operand.hbm [shape: f32[2,256], index: 0, kind: input, shape index: {}]   ;;  %s216_s1 = inlined_call_operand.hbm [shape: f32[1,2048], index: 1, kind: input, shape index: {}]   ;;  %s217_s2 = inlined_call_operand.hbm [shape: f32[2,256], index: 2, kind: output, shape index: {}]  }
   0x1   :  { %8 = vsyncpa [#allocation6], 0 }
   0x2   :  { %9 = vsyncpa [#allocation4], 0  ;;  %s150_s9 = smov [#allocation2]   ;;  %s151_s11 = smov [#allocation5]  }
   0x3   :  { %s16_s10 = sshll.u32 %s150_s9, 4  ;;  %s26_s12 = sshll.u32 %s151_s11, 4  ;;  %s17_s10 = int_to_ptr.vmem [resolvable:$true] %s16_s10  ;;  %s169_s12 = int_to_ptr.vmem [resolvable:$true] %s26_s12 }
   0x4   :  { %s78_s15 = scalar_lea.hbm %s215_s0, 64 }
   0x5   :  { %p79_p0 = scmp.ne.s32.totalorder %s215_s0, %s78_s15  ;;  %p82_p1 = scmp.lt.u32.totalorder %s78_s15, %s215_s0 }
   0x7   :  { %p84_p2 = pnand %p82_p1, %p79_p0 }
   0x9   :  { %87 = shalt.err (!%p84_p2)
}
   0xa   :  { %s88_s20 = scalar_lea.vmem %s17_s10, 64  ;;  %p93_p4 = scmp.lt.s32.totalorder %s17_s10, %s17_s10 }
   0xb   :  { %p89_p3 = scmp.ne.s32.totalorder %s17_s10, %s88_s20  ;;  %p94_p5 = scmp.lt.s32.totalorder %s88_s20, %s88_s20 }
   0xd   :  { %p95_p6 = por %p94_p5, %p93_p4 }
   0xf   :  { %p96_p7 = pnand %p95_p6, %p89_p3 }
  0x11   :  { %99 = shalt.err (!%p96_p7)
}
  0x12   :  { %19 = dma.hbm_to_vmem [thread:$0]  %s215_s0, 64, %s17_s10, [#allocation3]  }
  0x13   :  { %s100_s25 = scalar_lea.hbm %s216_s1, 32  ;;  %s102_s30 = scalar_lea.hbm %s216_s1, 256 }
  0x14   :  { %p101_p8 = scmp.ne.s32.totalorder %s216_s1, %s100_s25  ;;  %p103_p9 = scmp.lt.u32.totalorder %s102_s30, %s100_s25 }
  0x15   :  { %p104_p10 = scmp.lt.u32.totalorder %s100_s25, %s216_s1 }
  0x17   :  { %p105_p11 = por %p104_p10, %p103_p9 }
  0x19   :  { %p106_p12 = pnand %p105_p11, %p101_p8 }
  0x1b   :  { %109 = shalt.err (!%p106_p12)
}
  0x1c   :  { %s110_s0 = scalar_lea.vmem %s169_s12, 32  ;;  %p115_p0 = scmp.lt.s32.totalorder %s169_s12, %s169_s12 }
  0x1d   :  { %p111_p13 = scmp.ne.s32.totalorder %s169_s12, %s110_s0  ;;  %p116_p1 = scmp.lt.s32.totalorder %s110_s0, %s110_s0 }
  0x1f   :  { %p117_p2 = por %p116_p1, %p115_p0 }
  0x21   :  { %p118_p3 = pnand %p117_p2, %p111_p13 }
  0x23   :  { %121 = shalt.err (!%p118_p3)
}
  0x24   :  { %29 = dma.hbm_to_vmem [thread:$0]  %s216_s1, 32, %s169_s12, [#allocation6]  }
  0x25   :  { %144 = dma.done.wait [#allocation3], 64  }
  0x26   :  { %145 = vsyncadd [#allocation3], 4294967232 }
  0x27   :  { %146 = dma.done.wait [#allocation6], 32  }
  0x28   :  { %147 = vsyncadd [#allocation6], 4294967264  ;;  %v39_v0 = vlaneseq  ;;  %v152_v1 = vmov 1983009808   ;;  %v37_v7 = vld [vmem:[#allocation5] sm:$0x3] }
  0x29   :  { %v49_v2 = vunpack.c.l.s4 %v152_v1  ;;  %v36_v12 = vld [vmem:[#allocation2] sm:$0xf]  ;;  %s153_s7 = smov [#allocation7]  }
  0x2a   :  { %v40_v3 = vshrl.u32 %v39_v0, 7  ;;  %s64_s8 = sshll.u32 %s153_s7, 4  ;;  %s65_s8 = int_to_ptr.vmem [resolvable:$true] %s64_s8 }
  0x2b   :  { %v50_v6 = vunpack.c.0.s8 %v49_v2  ;;  %s122_s1 = scalar_lea.vmem %s65_s8, 64  ;;  %p127_p5 = scmp.lt.s32.totalorder %s65_s8, %s65_s8 }
  0x2c   :  { %v41_v4 = vsub.s32 0, %v40_v3  ;;  %v45_v5 = vsub.s32 1, %v40_v3  ;;  %p123_p4 = scmp.ne.s32.totalorder %s65_s8, %s122_s1  ;;  %p128_p6 = scmp.lt.s32.totalorder %s122_s1, %s122_s1 }
  0x2d   :  { %v53_v10 = vsub.s32 %v50_v6, %v40_v3 }
  0x2e   :  { %v42_v8 = vrot.slane %v37_v7, %v41_v4  ;;  %v46_v9 = vrot.slane %v37_v7, %v45_v5  ;;  %p129_p7 = por %p128_p6, %p127_p5 }
  0x30   :  { %v47_v11 = vcombine.low %v42_v8, %v46_v9  ;;  %p130_p8 = pnand %p129_p7, %p123_p4 }
  0x32   :  { %v54_v13 = vrot.slane %v47_v11, %v53_v10 }
  0x34   :  { %v56_v14 = vadd.f32 %v54_v13, %v36_v12 }
  0x36   :  { %57 = vst [vmem:[#allocation7] sm:$0xf] %v56_v14 }
  0x37   :  { %133 = shalt.err (!%p130_p8)
}
  0x38   :  { %s134_s11 = scalar_lea.hbm %s217_s2, 64 }
  0x39   :  { %p135_p9 = scmp.ne.s32.totalorder %s217_s2, %s134_s11  ;;  %p138_p10 = scmp.lt.u32.totalorder %s134_s11, %s217_s2 }
  0x3b   :  { %p140_p11 = pnand %p138_p10, %p135_p9 }
  0x3d   :  { %143 = shalt.err (!%p140_p11)
}
  0x3e   :  { %67 = dma.vmem_to_hbm [thread:$0]  %s65_s8, 64, %s217_s2, [#allocation4]  }
  0x3f   :  { %148 = dma.done.wait [#allocation4], 64  }
  0x40   :  { %149 = vsyncadd [#allocation4], 4294967232 }
  0x41   :  { %71 = vsyncpa [#allocation3], 1 }
  0x42   :  { %72 = vsyncpa [#allocation6], 1 }
  0x43   :  { %73 = vsyncpa [#allocation4], 1 }

</bundles_post_ra>
